<compile_context>
chip_gen: v6e
topology: v6e:2x2x1
jax: 0.10.0
libtpu: 0.0.40
codegen_flags: <defaults>
</compile_context>

<pallas_src>
import functools

import jax
import jax.numpy as jnp
from jax.experimental import pallas as pl
from jax.experimental.pallas import tpu as pltpu


_LANE = 128
_SUBLANE = 8
_MAX_TILE_C = 2048  # lanes per tile (multiple of 128)


def _cdiv(a, b):
    return (a + b - 1) // b


def _round_up(x, m):
    return _cdiv(x, m) * m


def _device_budgets():
    """(vmem_limit_bytes, per-x-tile byte budget) derived from the actual chip."""
    cap = None
    try:
        cap = getattr(pltpu.get_tpu_info(), "vmem_capacity_bytes", None)
    except Exception:
        cap = None
    if not cap:
        cap = 64 * 1024 * 1024  # conservative default: v7x per-TC VMEM
    vmem_limit = min(int(cap) * 3 // 4, 96 * 1024 * 1024)   # 48 MiB on v7x, 96 MiB on v5e/v6e
    # Double-buffered in + out tiles plus one f32 intermediate must fit comfortably.
    tile_budget = max(2 * 1024 * 1024, vmem_limit // 8)      # 6 MiB on v7x, 12 MiB on v5e/v6e
    return vmem_limit, tile_budget


def _plan_tiles(R, M, itemsize, tile_budget_bytes, min_row_blocks=1):
    """Pick a fixed (tile_r, tile_c).

    No divisibility requirement: grids use pl.cdiv and ragged edge blocks are
    handled in-kernel, so there is never any wrapper pad / slice traffic.
    """
    M_pad = _round_up(M, _LANE)
    tile_c = min(M_pad, _MAX_TILE_C)                 # lane-dense, >= 512 whenever M allows

    R_pad = _round_up(R, _SUBLANE)
    max_rows = max(_SUBLANE,
                   (tile_budget_bytes // (tile_c * itemsize)) // _SUBLANE * _SUBLANE)
    tile_r = min(R_pad, max_rows)
    if min_row_blocks > 1 and R_pad > _SUBLANE:
        # Keep >= min_row_blocks row blocks so the 'parallel' row axis can be
        # sharded across both TensorCores on v7x (free on single-TC v5e/v6e).
        cap = max(_SUBLANE, _round_up(_cdiv(R_pad, min_row_blocks), _SUBLANE))
        tile_r = min(tile_r, cap)
    return tile_r, tile_c


# --------------------------------------------------------------------------
# Kernel 1: streaming per-row sum / sum-of-squares (single-pass statistics).
# Column (reduction) grid axis is last; lane-wise partials accumulate into
# (tile_r, 128) f32 scratch, cross-lane reduce happens once at the end.
# --------------------------------------------------------------------------
def _actnorm_stats_kernel(x_ref, sum_ref, sumsq_ref, acc_sum, acc_sq, *, M, tile_c):
    k = pl.program_id(1)

    @pl.when(k == 0)
    def _():
        acc_sum[...] = jnp.zeros_like(acc_sum)
        acc_sq[...] = jnp.zeros_like(acc_sq)

    x = x_ref[...].astype(jnp.float32)                      # (tile_r, tile_c)
    # Lane mask: a ragged edge column block holds unspecified data past column M.
    col = k * tile_c + jax.lax.broadcasted_iota(jnp.int32, x.shape, 1)
    x = jnp.where(col < M, x, 0.0)
    # (Ragged edge *rows* need no mask: their outputs are never written back.)

    s = acc_sum[...]
    q = acc_sq[...]
    for c0 in range(0, tile_c, _LANE):                      # static, lane-aligned slices
        chunk = x[:, c0:c0 + _LANE]
        s = s + chunk
        q = q + chunk * chunk
    acc_sum[...] = s
    acc_sq[...] = q

    @pl.when(k == pl.num_programs(1) - 1)
    def _():
        sum_ref[...] = jnp.sum(acc_sum[...], axis=-1, keepdims=True)
        sumsq_ref[...] = jnp.sum(acc_sq[...], axis=-1, keepdims=True)


def actnorm_row_stats(x2d, *, tile_r, tile_c, vmem_limit):
    R, M = x2d.shape
    grid = (_cdiv(R, tile_r), _cdiv(M, tile_c))
    kernel = functools.partial(_actnorm_stats_kernel, M=M, tile_c=tile_c)
    return pl.pallas_call(
        kernel,
        out_shape=(
            jax.ShapeDtypeStruct((R, 1), jnp.float32),
            jax.ShapeDtypeStruct((R, 1), jnp.float32),
        ),
        grid=grid,
        in_specs=[pl.BlockSpec((tile_r, tile_c), lambda i, k: (i, k))],
        out_specs=(
            pl.BlockSpec((tile_r, 1), lambda i, k: (i, 0)),
            pl.BlockSpec((tile_r, 1), lambda i, k: (i, 0)),
        ),
        scratch_shapes=[
            pltpu.VMEM((tile_r, _LANE), jnp.float32),
            pltpu.VMEM((tile_r, _LANE), jnp.float32),
        ],
        compiler_params=pltpu.CompilerParams(
            dimension_semantics=("parallel", "arbitrary"),
            vmem_limit_bytes=vmem_limit,
        ),
    )(x2d)


# --------------------------------------------------------------------------
# Kernel 2: actnorm application as a single fused multiply-add per element.
#   forward: y = (x + bias) * exp(logs)  ->  mul = exp(logs),  add = bias*exp(logs)
#   reverse: y = x * exp(-logs) - bias   ->  mul = exp(-logs), add = -bias
# exp / bias folding is precomputed in the wrapper on a tiny (C,) vector.
# Ragged edge blocks need no mask: out-of-bounds output writes are dropped.
# --------------------------------------------------------------------------
def _actnorm_apply_kernel(x_ref, mul_ref, add_ref, o_ref):
    o_ref[...] = (x_ref[...] * mul_ref[...] + add_ref[...]).astype(o_ref.dtype)


def actnorm_apply(x2d, mul_rows, add_rows, *, tile_r, tile_c, vmem_limit,
                  donate_input=False):
    R, M = x2d.shape
    grid = (_cdiv(R, tile_r), _cdiv(M, tile_c))
    return pl.pallas_call(
        _actnorm_apply_kernel,
        out_shape=jax.ShapeDtypeStruct((R, M), x2d.dtype),
        grid=grid,
        in_specs=[
            pl.BlockSpec((tile_r, tile_c), lambda i, j: (i, j)),
            pl.BlockSpec((tile_r, 1), lambda i, j: (i, 0)),
            pl.BlockSpec((tile_r, 1), lambda i, j: (i, 0)),
        ],
        out_specs=pl.BlockSpec((tile_r, tile_c), lambda i, j: (i, j)),
        input_output_aliases=({0: 0} if donate_input else {}),
        compiler_params=pltpu.CompilerParams(
            dimension_semantics=("parallel", "parallel"),
            vmem_limit_bytes=vmem_limit,
        ),
    )(x2d, mul_rows, add_rows)


# --------------------------------------------------------------------------
# Module-equivalent wrapper
# --------------------------------------------------------------------------
class ActNorm2d:
    """JAX/Pallas port of ActNorm2d (Glow activation normalization).

    Like the PyTorch original, the first call performs a data-dependent
    parameter initialization by mutating Python state (self.bias/self.logs/
    self.inited).  This is eager-mode behavior and is not jit-pure.
    # TODO(synk): expose a functional init for use under jax.jit.
    """

    def __init__(self, num_features, scale=1.0):
        self.num_features = num_features
        self.scale = float(scale)
        self.bias = jnp.zeros((1, num_features, 1, 1), jnp.float32)
        self.logs = jnp.zeros((1, num_features, 1, 1), jnp.float32)
        self.inited = False
        self.training = True
        self._vmem_limit, self._tile_budget = _device_budgets()

    def initialize_parameters(self, x):
        if not self.training:
            raise ValueError("In Eval mode, but ActNorm not inited")
        N, C, H, W = x.shape
        assert C == self.num_features
        R, M = N * C, H * W
        x2d = x.reshape(R, M)  # free, contiguous view of NCHW

        tile_r, tile_c = _plan_tiles(R, M, jnp.dtype(x.dtype).itemsize,
                                     self._tile_budget, min_row_blocks=4)
        row_sum, row_sumsq = actnorm_row_stats(
            x2d, tile_r=tile_r, tile_c=tile_c, vmem_limit=self._vmem_limit)

        sum_c = row_sum[:, 0].reshape(N, C).sum(axis=0)      # (C,)
        sumsq_c = row_sumsq[:, 0].reshape(N, C).sum(axis=0)  # (C,)

        count = float(N * H * W)
        mean = sum_c / count
        # Single-pass variance in f32; clamp guards the rare FP cancellation.
        # TODO(synk): shifted / Welford-style finalize if init precision at very
        # large N*H*W ever matters.
        var = jnp.maximum(sumsq_c / count - mean * mean, 0.0)
        bias = -mean
        logs = jnp.log(self.scale / (jnp.sqrt(var) + 1e-6))

        self.bias = bias.reshape(1, C, 1, 1).astype(jnp.float32)
        self.logs = logs.reshape(1, C, 1, 1).astype(jnp.float32)
        self.inited = True

    def __call__(self, x, reverse=False, donate_input=False):
        if not self.inited:
            self.initialize_parameters(x)
        N, C, H, W = x.shape
        R, M = N * C, H * W

        bias_c = self.bias.reshape(C).astype(jnp.float32)
        logs_c = self.logs.reshape(C).astype(jnp.float32)
        if reverse:
            mul_c = jnp.exp(-logs_c)
            add_c = -bias_c
        else:
            s = jnp.exp(logs_c)
            mul_c = s
            add_c = bias_c * s

        # Per-channel -> per-row (row r = n*C + c -> channel c); cast once to
        # x.dtype so the in-kernel FMA runs in the input precision (bf16-friendly).
        mul_rows = jnp.tile(mul_c, N).reshape(R, 1).astype(x.dtype)
        add_rows = jnp.tile(add_c, N).reshape(R, 1).astype(x.dtype)

        x2d = x.reshape(R, M)
        tile_r, tile_c = _plan_tiles(R, M, jnp.dtype(x.dtype).itemsize,
                                     self._tile_budget, min_row_blocks=2)
        y2d = actnorm_apply(x2d, mul_rows, add_rows,
                            tile_r=tile_r, tile_c=tile_c,
                            vmem_limit=self._vmem_limit,
                            donate_input=donate_input)
        return y2d.reshape(N, C, H, W)


def _reference(x, scale=1.0, reverse=False, bias=None, logs=None):
    """Pure-JAX mirror of the PyTorch math (two-pass init)."""
    if bias is None or logs is None:
        mean = jnp.mean(x, axis=(0, 2, 3), keepdims=True)
        bias = -mean
        var = jnp.mean((x + bias) ** 2, axis=(0, 2, 3), keepdims=True)
        logs = jnp.log(scale / (jnp.sqrt(var) + 1e-6))
    if reverse:
        return x * jnp.exp(-logs) - bias, bias, logs
    return (x + bias) * jnp.exp(logs), bias, logs


if __name__ == "__main__":
    key = jax.random.PRNGKey(0)

    # ---- aligned shape (matches the module's typical use) ------------------
    N, C, H, W = 2, 4, 16, 16
    x = jax.random.normal(key, (N, C, H, W), dtype=jnp.float32) * 2.0 + 0.5

    layer = ActNorm2d(num_features=C, scale=1.0)
    y = layer(x, reverse=False)          # first call: data-dependent init + forward
    y = jax.block_until_ready(y)

    y_ref, _, _ = _reference(x, scale=1.0)
    assert y.shape == x.shape and y.dtype == x.dtype
    assert jnp.allclose(y, y_ref, atol=1e-4, rtol=1e-4)

    # reverse pass round-trips (layer is now inited)
    x_rec = jax.block_until_ready(layer(y, reverse=True))
    assert jnp.allclose(x_rec, x, atol=1e-3, rtol=1e-3)

    # ---- unaligned shape: exercises the cdiv-grid ragged-edge handling -----
    N2, C2, H2, W2 = 3, 5, 10, 10        # R=15 (not %8), M=100 (not %128)
    x2 = jax.random.normal(jax.random.PRNGKey(1), (N2, C2, H2, W2),
                           dtype=jnp.float32) * 1.5 - 0.25
    layer2 = ActNorm2d(num_features=C2, scale=1.0)
    y2 = jax.block_until_ready(layer2(x2, reverse=False))
    y2_ref, _, _ = _reference(x2, scale=1.0)
    assert jnp.allclose(y2, y2_ref, atol=1e-4, rtol=1e-4)

    print("KERNEL_OK")
</pallas_src>

<mosaic_0001>
module attributes {stable_mosaic.version = 11 : i64} {
  func.func @_actnorm_stats_kernel(%arg0: i32, %arg1: i32, %arg2: memref<8x256xf32, #tpu.memory_space<vmem>>, %arg3: memref<8x1xf32, #tpu.memory_space<vmem>>, %arg4: memref<8x1xf32, #tpu.memory_space<vmem>>, %arg5: memref<8x128xf32, #tpu.memory_space<vmem>>, %arg6: memref<8x128xf32, #tpu.memory_space<vmem>>) attributes {dimension_semantics = [#tpu.dimension_semantics<parallel>, #tpu.dimension_semantics<arbitrary>], iteration_bounds = array<i64: 1, 1>, scalar_prefetch = 0 : i64, scratch_operands = 2 : i64, tpu.core_type = #tpu.core_type<tc>, window_params = [{transform_indices = @transform_0, window_bounds = array<i64: 8, 256>}, {transform_indices = @transform_1, window_bounds = array<i64: 8, 1>}, {transform_indices = @transform_2, window_bounds = array<i64: 8, 1>}]} {
    %c0_i32 = arith.constant 0 : i32
    %0 = arith.cmpi eq, %arg1, %c0_i32 : i32
    %1 = arith.extui %0 : i1 to i32
    %c0_i32_0 = arith.constant 0 : i32
    %2 = arith.cmpi ne, %1, %c0_i32_0 : i32
    scf.if %2 {
      %cst_13 = arith.constant 0.000000e+00 : f32
      %27 = vector.broadcast %cst_13 : f32 to vector<8x128xf32>
      %c0_14 = arith.constant 0 : index
      %c0_15 = arith.constant 0 : index
      %28 = vector.load %arg5[%c0_14, %c0_15] : memref<8x128xf32, #tpu.memory_space<vmem>>, vector<8x128xf32>
      tpu.vector_store %arg5[%c0_14, %c0_15], %27 {strides = array<i32>} : memref<8x128xf32, #tpu.memory_space<vmem>>, vector<8x128xf32>,
      %cst_16 = arith.constant 0.000000e+00 : f32
      %29 = vector.broadcast %cst_16 : f32 to vector<8x128xf32>
      %c0_17 = arith.constant 0 : index
      %c0_18 = arith.constant 0 : index
      %30 = vector.load %arg6[%c0_17, %c0_18] : memref<8x128xf32, #tpu.memory_space<vmem>>, vector<8x128xf32>
      tpu.vector_store %arg6[%c0_17, %c0_18], %29 {strides = array<i32>} : memref<8x128xf32, #tpu.memory_space<vmem>>, vector<8x128xf32>,
    } else {
    }
    %c0 = arith.constant 0 : index
    %c0_1 = arith.constant 0 : index
    %3 = vector.load %arg2[%c0, %c0_1] : memref<8x256xf32, #tpu.memory_space<vmem>>, vector<8x256xf32>
    %c256_i32 = arith.constant 256 : i32
    %4 = arith.muli %arg1, %c256_i32 : i32
    %5 = tpu.iota {dimensions = array<i32: 1>} : vector<8x256xi32>
    %6 = vector.broadcast %4 : i32 to vector<8x256xi32>
    %7 = arith.addi %6, %5 : vector<8x256xi32>
    %c256_i32_2 = arith.constant 256 : i32
    %8 = vector.broadcast %c256_i32_2 : i32 to vector<8x256xi32>
    %9 = arith.cmpi slt, %7, %8 : vector<8x256xi32>
    %cst = arith.constant 0.000000e+00 : f32
    %10 = vector.broadcast %cst : f32 to vector<8x256xf32>
    %11 = arith.select %9, %3, %10 : vector<8x256xi1>, vector<8x256xf32>
    %c0_3 = arith.constant 0 : index
    %c0_4 = arith.constant 0 : index
    %12 = vector.load %arg5[%c0_3, %c0_4] : memref<8x128xf32, #tpu.memory_space<vmem>>, vector<8x128xf32>
    %c0_5 = arith.constant 0 : index
    %c0_6 = arith.constant 0 : index
    %13 = vector.load %arg6[%c0_5, %c0_6] : memref<8x128xf32, #tpu.memory_space<vmem>>, vector<8x128xf32>
    %14 = vector.extract_strided_slice %11 {offsets = [0, 0], sizes = [8, 128], strides = [1, 1]} : vector<8x256xf32> to vector<8x128xf32>
    %15 = arith.addf %12, %14 : vector<8x128xf32>
    %16 = arith.mulf %14, %14 : vector<8x128xf32>
    %17 = arith.addf %13, %16 : vector<8x128xf32>
    %18 = vector.extract_strided_slice %11 {offsets = [0, 128], sizes = [8, 128], strides = [1, 1]} : vector<8x256xf32> to vector<8x128xf32>
    %19 = arith.addf %15, %18 : vector<8x128xf32>
    %20 = arith.mulf %18, %18 : vector<8x128xf32>
    %21 = arith.addf %17, %20 : vector<8x128xf32>
    %c0_7 = arith.constant 0 : index
    %c0_8 = arith.constant 0 : index
    %22 = vector.load %arg5[%c0_7, %c0_8] : memref<8x128xf32, #tpu.memory_space<vmem>>, vector<8x128xf32>
    tpu.vector_store %arg5[%c0_7, %c0_8], %19 {strides = array<i32>} : memref<8x128xf32, #tpu.memory_space<vmem>>, vector<8x128xf32>,
    %c0_9 = arith.constant 0 : index
    %c0_10 = arith.constant 0 : index
    %23 = vector.load %arg6[%c0_9, %c0_10] : memref<8x128xf32, #tpu.memory_space<vmem>>, vector<8x128xf32>
    tpu.vector_store %arg6[%c0_9, %c0_10], %21 {strides = array<i32>} : memref<8x128xf32, #tpu.memory_space<vmem>>, vector<8x128xf32>,
    %c0_i32_11 = arith.constant 0 : i32
    %24 = arith.cmpi eq, %arg1, %c0_i32_11 : i32
    %25 = arith.extui %24 : i1 to i32
    %c0_i32_12 = arith.constant 0 : i32
    %26 = arith.cmpi ne, %25, %c0_i32_12 : i32
    scf.if %26 {
      %c0_13 = arith.constant 0 : index
      %c0_14 = arith.constant 0 : index
      %27 = vector.load %arg5[%c0_13, %c0_14] : memref<8x128xf32, #tpu.memory_space<vmem>>, vector<8x128xf32>
      %cst_15 = arith.constant dense<0.000000e+00> : vector<8xf32>
      %28 = vector.multi_reduction <add>, %27, %cst_15 [1] : vector<8x128xf32> to vector<8xf32>
      %29 = vector.shape_cast %28 : vector<8xf32> to vector<8x1xf32>
      %c0_16 = arith.constant 0 : index
      %c0_17 = arith.constant 0 : index
      %30 = vector.load %arg3[%c0_16, %c0_17] : memref<8x1xf32, #tpu.memory_space<vmem>>, vector<8x1xf32>
      tpu.vector_store %arg3[%c0_16, %c0_17], %29 {strides = array<i32>} : memref<8x1xf32, #tpu.memory_space<vmem>>, vector<8x1xf32>,
      %c0_18 = arith.constant 0 : index
      %c0_19 = arith.constant 0 : index
      %31 = vector.load %arg6[%c0_18, %c0_19] : memref<8x128xf32, #tpu.memory_space<vmem>>, vector<8x128xf32>
      %cst_20 = arith.constant dense<0.000000e+00> : vector<8xf32>
      %32 = vector.multi_reduction <add>, %31, %cst_20 [1] : vector<8x128xf32> to vector<8xf32>
      %33 = vector.shape_cast %32 : vector<8xf32> to vector<8x1xf32>
      %c0_21 = arith.constant 0 : index
      %c0_22 = arith.constant 0 : index
      %34 = vector.load %arg4[%c0_21, %c0_22] : memref<8x1xf32, #tpu.memory_space<vmem>>, vector<8x1xf32>
      tpu.vector_store %arg4[%c0_21, %c0_22], %33 {strides = array<i32>} : memref<8x1xf32, #tpu.memory_space<vmem>>, vector<8x1xf32>,
    } else {
    }
    return
  }
  func.func @transform_0(%arg0: i32, %arg1: i32) -> (i32, i32) {
    %c0_i32 = arith.constant 0 : i32
    return %arg0, %arg1 : i32, i32
  }
  func.func @transform_1(%arg0: i32, %arg1: i32) -> (i32, i32) {
    %c0_i32 = arith.constant 0 : i32
    %c0_i32_0 = arith.constant 0 : i32
    return %arg0, %c0_i32 : i32, i32
  }
  func.func @transform_2(%arg0: i32, %arg1: i32) -> (i32, i32) {
    %c0_i32 = arith.constant 0 : i32
    %c0_i32_0 = arith.constant 0 : i32
    return %arg0, %c0_i32 : i32, i32
  }
}

</mosaic_0001>

<bundles_post_ra>
// kernel: tpu_custom_call.1
= control target key start
LH: loop header
LB: loop body
LE: loop exit
PB: predicated region body
PF: predicated region fallthrough
CT: control target
= control target key end

     0   :  { %8 = vsyncpa [#allocation5], 0  ;;  %s95_s9 = smov [#allocation4]   ;;  %s120_s0 = inlined_call_operand.hbm [shape: f32[8,256], index: 0, kind: input, shape index: {}]   ;;  %s121_s1 = inlined_call_operand.vmem [shape: f32[8,1], index: 1, kind: output, shape index: {0}]   ;;  %s122_s2 = inlined_call_operand.vmem [shape: f32[8,1], index: 2, kind: output, shape index: {1}]  }
   0x1   :  { %s15_s10 = sshll.u32 %s95_s9, 4  ;;  %s16_s10 = int_to_ptr.vmem [resolvable:$true] %s15_s10 }
   0x2   :  { %s81_s11 = scalar_lea.vmem %s16_s10, 256  ;;  %p86_p1 = scmp.lt.s32.totalorder %s16_s10, %s16_s10 }
   0x3   :  { %p82_p0 = scmp.ne.s32.totalorder %s16_s10, %s81_s11  ;;  %p87_p2 = scmp.lt.s32.totalorder %s81_s11, %s81_s11 }
   0x5   :  { %p88_p3 = por %p87_p2, %p86_p1 }
   0x7   :  { %p89_p4 = pnand %p88_p3, %p82_p0 }
   0x9   :  { %92 = shalt.err (!%p89_p4)
}
   0xa   :  { %18 = dma.hbm_to_vmem [thread:$0]  %s120_s0, 256, %s16_s10, [#allocation5]  }
   0xb   :  { %93 = dma.done.wait [#allocation5], 256  }
   0xc   :  { %94 = vsyncadd [#allocation5], 4294967040  ;;  %v28_v0 = vld [vmem:[#allocation4] sm:$0xff]  ;;  %v29_v1 = vld [vmem:[#allocation4 + $0x8] sm:$0xff]  ;;  %vm57_vm0 = vcmask 7168  }
   0xd   :  { %v46_v2 = vadd.f32 %v29_v1, %v28_v0  ;;  %v47_v3 = vmul.f32 %v29_v1, %v29_v1  ;;  %v44_v4 = vmul.f32 %v28_v0, %v28_v0 }
   0xf   :  { %55 = vadd.xlane.f32.xlu0 %v46_v2  ;;  %v48_v5 = vadd.f32 %v47_v3, %v44_v4 }
  0x13   :  { %60 = vadd.xlane.f32.xlu0 %v48_v5 }
  0x98   :  { %v56_v6 = vpop.xlane.xlu0 %55 }
  0x99   :  { %58 = vst.msk [vmem:[%s121_s1] sm:$0xff] %vm57_vm0, %v56_v6 }
  0x9c   :  { %v61_v7 = vpop.xlane.xlu0 %60 }
  0x9d   :  { %62 = vst.msk [vmem:[%s122_s2] sm:$0xff] %vm57_vm0, %v61_v7 }
  0x9e   :  { %71 = vsyncpa [#allocation5], 1 }

</bundles_post_ra>
